<compile_context>
chip_gen: v7x
topology: tpu7x:2x2x1
jax: 0.10.0
libtpu: 0.0.40
codegen_flags: <defaults>
</compile_context>

<pallas_src>
import functools

import jax
import jax.numpy as jnp
from jax.experimental import pallas as pl
from jax.experimental.pallas import tpu as pltpu


def _round_up(n, m):
    return ((n + m - 1) // m) * m


def _mlp_kernel(x_ref, w1_ref, b1_ref, w2_ref, b2_ref, w3_ref, b3_ref, o_ref):
    # Shapes (feature-major, batch on lanes):
    #   x_ref : (d_in,  block)      w1_ref: (hidden, d_in)   b1_ref: (hidden, 1)
    #   w2_ref: (hidden, hidden)    b2_ref: (hidden, 1)
    #   w3_ref: (d_out, hidden)     b3_ref: (d_out, 1)       o_ref : (d_out, block)
    x = x_ref[...]
    d_in = x.shape[0]

    # Layer 1: Linear(input_dim -> hidden_dim) + ReLU
    if d_in == 1:
        # K=1 contraction is an outer product: keep it on the VPU,
        # (hidden, 1) * (1, block) -> (hidden, block), no MXU round trip.
        h = w1_ref[...] * x
    else:
        h = jnp.dot(w1_ref[...], x, preferred_element_type=jnp.float32)
    h = jnp.maximum(h + b1_ref[...], 0.0)

    # Layer 2: Linear(hidden_dim -> hidden_dim) + ReLU  (MXU)
    h = jnp.dot(w2_ref[...], h, preferred_element_type=jnp.float32)
    h = jnp.maximum(h + b2_ref[...], 0.0)

    # Layer 3: Linear(hidden_dim -> output_dim), no activation
    out = jnp.dot(w3_ref[...], h, preferred_element_type=jnp.float32) + b3_ref[...]
    o_ref[...] = out.astype(o_ref.dtype)


@functools.partial(jax.jit, static_argnames=("block_b",))
def mlp_forward(x, w1, b1, w2, b2, w3, b3, *, block_b=2048):
    """x: (B, input_dim) f32; weights in PyTorch (out, in) layout; biases (out, 1)."""
    B, d_in = x.shape
    hidden = w1.shape[0]
    d_out = w3.shape[0]

    # Batch tile: lane-dense (multiple of 128), capped by the (padded) batch.
    block = min(_round_up(block_b, 128), _round_up(B, 128))
    B_pad = _round_up(B, block)

    # Pad ragged batches in the wrapper; padded rows are sliced off afterwards.
    xp = x if B_pad == B else jnp.pad(x, ((0, B_pad - B), (0, 0)))
    xt = xp.T  # (d_in, B_pad) -- batch on the lane axis

    grid = (B_pad // block,)
    full = lambda i: (0, 0)  # weights/biases: same full block every grid step

    flops = 2 * B_pad * (d_in * hidden + hidden * hidden + hidden * d_out)
    bytes_accessed = 4 * (
        B_pad * (d_in + d_out)
        + hidden * d_in + hidden * hidden + d_out * hidden + 2 * hidden + d_out
    )

    out_t = pl.pallas_call(
        _mlp_kernel,
        out_shape=jax.ShapeDtypeStruct((d_out, B_pad), x.dtype),
        grid_spec=pltpu.PrefetchScalarGridSpec(
            num_scalar_prefetch=0,
            grid=grid,
            in_specs=[
                pl.BlockSpec((d_in, block), lambda i: (0, i)),   # x^T tile
                pl.BlockSpec((hidden, d_in), full),              # w1
                pl.BlockSpec((hidden, 1), full),                 # b1
                pl.BlockSpec((hidden, hidden), full),            # w2
                pl.BlockSpec((hidden, 1), full),                 # b2
                pl.BlockSpec((d_out, hidden), full),             # w3
                pl.BlockSpec((d_out, 1), full),                  # b3
            ],
            out_specs=pl.BlockSpec((d_out, block), lambda i: (0, i)),
        ),
        compiler_params=pltpu.CompilerParams(
            dimension_semantics=("parallel",),
        ),
        cost_estimate=pl.CostEstimate(
            flops=flops, transcendentals=0, bytes_accessed=bytes_accessed
        ),
    )(xt, w1, b1, w2, b2, w3, b3)

    # Back to (B, d_out) row-major and drop padding.
    return out_t.T[:B]


def init_params(key, input_dim=1, hidden_dim=32, output_dim=1):
    """Deterministic init mimicking nn.Linear's U(-1/sqrt(fan_in), 1/sqrt(fan_in)).

    Weights are kept in PyTorch layout (out, in); biases as (out, 1)."""
    ks = jax.random.split(key, 6)

    def linear(kw, kb, fan_in, fan_out):
        bound = 1.0 / jnp.sqrt(jnp.asarray(fan_in, jnp.float32))
        w = jax.random.uniform(kw, (fan_out, fan_in), jnp.float32, -bound, bound)
        b = jax.random.uniform(kb, (fan_out, 1), jnp.float32, -bound, bound)
        return w, b

    w1, b1 = linear(ks[0], ks[1], input_dim, hidden_dim)
    w2, b2 = linear(ks[2], ks[3], hidden_dim, hidden_dim)
    w3, b3 = linear(ks[4], ks[5], hidden_dim, output_dim)
    return w1, b1, w2, b2, w3, b3


def mlp_reference(x, w1, b1, w2, b2, w3, b3):
    h = jnp.maximum(x @ w1.T + b1.T, 0.0)
    h = jnp.maximum(h @ w2.T + b2.T, 0.0)
    return h @ w3.T + b3.T


if __name__ == "__main__":
    key = jax.random.PRNGKey(0)
    k_x, k_p = jax.random.split(key)

    batch, input_dim, hidden_dim, output_dim = 8, 1, 32, 1
    x = jax.random.normal(k_x, (batch, input_dim), jnp.float32)
    params = init_params(k_p, input_dim, hidden_dim, output_dim)

    out = mlp_forward(x, *params)
    out = jax.block_until_ready(out)

    ref = mlp_reference(x, *params)
    assert out.shape == (batch, output_dim)
    assert jnp.allclose(out, ref, atol=1e-5, rtol=1e-5), "mismatch vs reference"

    print("KERNEL_OK")
</pallas_src>

<mosaic_0001>
module attributes {stable_mosaic.version = 11 : i64} {
  func.func @_mlp_kernel(%arg0: i32, %arg1: memref<1x128xf32, #tpu.memory_space<vmem>>, %arg2: memref<32x1xf32, #tpu.memory_space<vmem>>, %arg3: memref<32x1xf32, #tpu.memory_space<vmem>>, %arg4: memref<32x32xf32, #tpu.memory_space<vmem>>, %arg5: memref<32x1xf32, #tpu.memory_space<vmem>>, %arg6: memref<1x32xf32, #tpu.memory_space<vmem>>, %arg7: memref<1x1xf32, #tpu.memory_space<vmem>>, %arg8: memref<1x128xf32, #tpu.memory_space<vmem>>) attributes {dimension_semantics = [#tpu.dimension_semantics<parallel>], iteration_bounds = array<i64: 1>, scalar_prefetch = 0 : i64, scratch_operands = 0 : i64, tpu.core_type = #tpu.core_type<tc>, window_params = [{transform_indices = @transform_0, window_bounds = array<i64: 1, 128>}, {pipeline_mode = #tpu.pipeline_mode<synchronous>, transform_indices = @transform_1, window_bounds = array<i64: 32, 1>}, {pipeline_mode = #tpu.pipeline_mode<synchronous>, transform_indices = @transform_2, window_bounds = array<i64: 32, 1>}, {pipeline_mode = #tpu.pipeline_mode<synchronous>, transform_indices = @transform_3, window_bounds = array<i64: 32, 32>}, {pipeline_mode = #tpu.pipeline_mode<synchronous>, transform_indices = @transform_4, window_bounds = array<i64: 32, 1>}, {pipeline_mode = #tpu.pipeline_mode<synchronous>, transform_indices = @transform_5, window_bounds = array<i64: 1, 32>}, {pipeline_mode = #tpu.pipeline_mode<synchronous>, transform_indices = @transform_6, window_bounds = array<i64: 1, 1>}, {transform_indices = @transform_7, window_bounds = array<i64: 1, 128>}]} {
    %c0 = arith.constant 0 : index
    %c0_0 = arith.constant 0 : index
    %0 = vector.load %arg1[%c0, %c0_0] : memref<1x128xf32, #tpu.memory_space<vmem>>, vector<1x128xf32>
    %c0_1 = arith.constant 0 : index
    %c0_2 = arith.constant 0 : index
    %1 = vector.load %arg2[%c0_1, %c0_2] : memref<32x1xf32, #tpu.memory_space<vmem>>, vector<32x1xf32>
    %2 = vector.broadcast %1 : vector<32x1xf32> to vector<32x128xf32>
    %3 = vector.broadcast %0 : vector<1x128xf32> to vector<32x128xf32>
    %4 = arith.mulf %2, %3 : vector<32x128xf32>
    %c0_3 = arith.constant 0 : index
    %c0_4 = arith.constant 0 : index
    %5 = vector.load %arg3[%c0_3, %c0_4] : memref<32x1xf32, #tpu.memory_space<vmem>>, vector<32x1xf32>
    %6 = vector.broadcast %5 : vector<32x1xf32> to vector<32x128xf32>
    %7 = arith.addf %4, %6 : vector<32x128xf32>
    %cst = arith.constant 0.000000e+00 : f32
    %8 = vector.broadcast %cst : f32 to vector<32x128xf32>
    %9 = arith.maximumf %7, %8 : vector<32x128xf32>
    %c0_5 = arith.constant 0 : index
    %c0_6 = arith.constant 0 : index
    %10 = vector.load %arg4[%c0_5, %c0_6] : memref<32x32xf32, #tpu.memory_space<vmem>>, vector<32x32xf32>
    %cst_7 = arith.constant dense<0.000000e+00> : vector<32x128xf32>
    %11 = tpu.matmul %10, %9, %cst_7 {dimension_numbers = #tpu.dot_dimension_numbers<[1], [0], [0], [1], [0, 0, 1, 1], [], []>} : vector<32x32xf32>, vector<32x128xf32>, vector<32x128xf32> -> vector<32x128xf32>
    %c0_8 = arith.constant 0 : index
    %c0_9 = arith.constant 0 : index
    %12 = vector.load %arg5[%c0_8, %c0_9] : memref<32x1xf32, #tpu.memory_space<vmem>>, vector<32x1xf32>
    %13 = vector.broadcast %12 : vector<32x1xf32> to vector<32x128xf32>
    %14 = arith.addf %11, %13 : vector<32x128xf32>
    %cst_10 = arith.constant 0.000000e+00 : f32
    %15 = vector.broadcast %cst_10 : f32 to vector<32x128xf32>
    %16 = arith.maximumf %14, %15 : vector<32x128xf32>
    %c0_11 = arith.constant 0 : index
    %c0_12 = arith.constant 0 : index
    %17 = vector.load %arg6[%c0_11, %c0_12] : memref<1x32xf32, #tpu.memory_space<vmem>>, vector<1x32xf32>
    %cst_13 = arith.constant dense<0.000000e+00> : vector<1x128xf32>
    %18 = tpu.matmul %17, %16, %cst_13 {dimension_numbers = #tpu.dot_dimension_numbers<[1], [0], [0], [1], [0, 0, 1, 1], [], []>} : vector<1x32xf32>, vector<32x128xf32>, vector<1x128xf32> -> vector<1x128xf32>
    %c0_14 = arith.constant 0 : index
    %c0_15 = arith.constant 0 : index
    %19 = vector.load %arg7[%c0_14, %c0_15] : memref<1x1xf32, #tpu.memory_space<vmem>>, vector<1x1xf32>
    %20 = vector.broadcast %19 : vector<1x1xf32> to vector<1x128xf32>
    %21 = arith.addf %18, %20 : vector<1x128xf32>
    %c0_16 = arith.constant 0 : index
    %c0_17 = arith.constant 0 : index
    %22 = vector.load %arg8[%c0_16, %c0_17] : memref<1x128xf32, #tpu.memory_space<vmem>>, vector<1x128xf32>
    tpu.vector_store %arg8[%c0_16, %c0_17], %21 {strides = array<i32>} : memref<1x128xf32, #tpu.memory_space<vmem>>, vector<1x128xf32>,
    return
  }
  func.func @transform_0(%arg0: i32) -> (i32, i32) {
    %c0_i32 = arith.constant 0 : i32
    %c0_i32_0 = arith.constant 0 : i32
    return %c0_i32, %arg0 : i32, i32
  }
  func.func @transform_1(%arg0: i32) -> (i32, i32) {
    %c0_i32 = arith.constant 0 : i32
    %c0_i32_0 = arith.constant 0 : i32
    %c0_i32_1 = arith.constant 0 : i32
    return %c0_i32, %c0_i32_0 : i32, i32
  }
  func.func @transform_2(%arg0: i32) -> (i32, i32) {
    %c0_i32 = arith.constant 0 : i32
    %c0_i32_0 = arith.constant 0 : i32
    %c0_i32_1 = arith.constant 0 : i32
    return %c0_i32, %c0_i32_0 : i32, i32
  }
  func.func @transform_3(%arg0: i32) -> (i32, i32) {
    %c0_i32 = arith.constant 0 : i32
    %c0_i32_0 = arith.constant 0 : i32
    %c0_i32_1 = arith.constant 0 : i32
    return %c0_i32, %c0_i32_0 : i32, i32
  }
  func.func @transform_4(%arg0: i32) -> (i32, i32) {
    %c0_i32 = arith.constant 0 : i32
    %c0_i32_0 = arith.constant 0 : i32
    %c0_i32_1 = arith.constant 0 : i32
    return %c0_i32, %c0_i32_0 : i32, i32
  }
  func.func @transform_5(%arg0: i32) -> (i32, i32) {
    %c0_i32 = arith.constant 0 : i32
    %c0_i32_0 = arith.constant 0 : i32
    %c0_i32_1 = arith.constant 0 : i32
    return %c0_i32, %c0_i32_0 : i32, i32
  }
  func.func @transform_6(%arg0: i32) -> (i32, i32) {
    %c0_i32 = arith.constant 0 : i32
    %c0_i32_0 = arith.constant 0 : i32
    %c0_i32_1 = arith.constant 0 : i32
    return %c0_i32, %c0_i32_0 : i32, i32
  }
  func.func @transform_7(%arg0: i32) -> (i32, i32) {
    %c0_i32 = arith.constant 0 : i32
    %c0_i32_0 = arith.constant 0 : i32
    return %c0_i32, %arg0 : i32, i32
  }
}

</mosaic_0001>

<bundles_post_ra>
// kernel: mlp_forward.1
= control target key start
LH: loop header
LB: loop body
LE: loop exit
PB: predicated region body
PF: predicated region fallthrough
CT: control target
= control target key end

     0   :  { %v378_v0 = vmov 0   ;;  %vm123_vm0 = vcmask 261120   ;;  %v379_v42 = vmov 0.0|0.0   ;;  %vm380_vm1 = vmmov 0   ;;  %s487_s2 = inlined_call_operand.vmem [shape: f32[32,1], index: 2, kind: input, shape index: {}]   ;;  %s488_s1 = inlined_call_operand.vmem [shape: f32[32,1], index: 1, kind: input, shape index: {}]   ;;  %s489_s6 = inlined_call_operand.<no memory space> [shape: f32[1,1], index: 6, kind: input, shape index: {}]   ;;  %s490_s4 = inlined_call_operand.vmem [shape: f32[32,1], index: 4, kind: input, shape index: {}]   ;;  %s491_s3 = inlined_call_operand.vmem [shape: f32[32,32], index: 3, kind: input, shape index: {}]   ;;  %s492_s0 = inlined_call_operand.vmem [shape: f32[1,128], index: 0, kind: input, shape index: {}]   ;;  %s493_s5 = inlined_call_operand.vmem [shape: f32[1,32], index: 5, kind: input, shape index: {}]   ;;  %s494_s7 = inlined_call_operand.vmem [shape: f32[1,128], index: 7, kind: output, shape index: {}]  }
   0x1   :  { %377 = vset.pattern.permute.xlu1 %v378_v0  ;;  %376 = vset.pattern.permute.xlu0 %v378_v0  ;;  %v63_v1 = vld [vmem:[%s487_s2] sm:$0xff]  ;;  %v12_v3 = vstv %s489_s6  ;;  %v64_v4 = vld [vmem:[%s487_s2 + $0x8] sm:$0xff]  ;;  %v32_v6 = vld [vmem:[%s488_s1 + $0x18] sm:$0xff]  ;;  %v381_v43 = vmov 0.0   ;;  %v232_v63 = vlaneseq }
   0x2   :  { %v29_v2 = vld [vmem:[%s488_s1] sm:$0xff]  ;;  %69 = vperm.xlu1 %377, %v63_v1   ;;  %13 = vst [vmem:[#allocation2] sm:$0x1] %v12_v3  ;;  %v30_v5 = vld [vmem:[%s488_s1 + $0x8] sm:$0xff]  ;;  %v31_v7 = vld [vmem:[%s488_s1 + $0x10] sm:$0xff]  ;;  %366 = vmatprep.subr.bf16.mxu1 %v379_v42 }
   0x3   :  { %35 = vperm.xlu0 %376, %v29_v2   ;;  %v66_v8 = vld [vmem:[%s487_s2 + $0x18] sm:$0xff]  ;;  %v65_v9 = vld [vmem:[%s487_s2 + $0x10] sm:$0xff]  ;;  %v100_v10 = vld [vmem:[%s490_s4 + $0x8] sm:$0xff]  ;;  %355 = vmatprep.mubr.msk.f32.mxu1 %vm380_vm1, %v381_v43  ;;  %v233_v0 = vshrl.u32 %v232_v63, 7 }
   0x4   :  { %v99_v11 = vld [vmem:[%s490_s4] sm:$0xff]  ;;  %v102_v12 = vld [vmem:[%s490_s4 + $0x18] sm:$0xff]  ;;  %v101_v13 = vld [vmem:[%s490_s4 + $0x10] sm:$0xff] }
   0x5   :  { %v95_v14 = vld [vmem:[%s491_s3] sm:$0xff]  ;;  %v96_v39 = vld [vmem:[%s491_s3 + $0x8] sm:$0xff]  ;;  %v97_v40 = vld [vmem:[%s491_s3 + $0x10] sm:$0xff]  ;;  %v234_v1 = vsub.s32 0, %v233_v0 }
   0x6   :  { %74 = vperm.xlu1 %377, %v64_v4   ;;  %341 = vmatprep.mubr.msk.f32.mxu0 %vm123_vm0, %v95_v14  ;;  %v314_v16 = vld [vmem:[%s492_s0] ss:$0 sm:$0xff]  ;;  %v98_v41 = vld [vmem:[%s491_s3 + $0x18] sm:$0xff] }
   0x7   :  { %40 = vperm.xlu0 %376, %v30_v5   ;;  %v225_v62 = vld [vmem:[%s493_s5] sm:$0x1] }
   0x9   :  { %v226_v15 = vld [vmem:[#allocation2] sm:$0x1] }
   0xa   :  { %50 = vperm.xlu1 %377, %v32_v6  }
   0xb   :  { %45 = vperm.xlu0 %376, %v31_v7  }
   0xe   :  { %84 = vperm.xlu1 %377, %v66_v8  }
   0xf   :  { %79 = vperm.xlu0 %376, %v65_v9  }
  0x12   :  { %110 = vperm.xlu1 %377, %v100_v10  }
  0x13   :  { %105 = vperm.xlu0 %376, %v99_v11  }
  0x16   :  { %120 = vperm.xlu1 %377, %v102_v12  }
  0x17   :  { %115 = vperm.xlu0 %376, %v101_v13  }
  0x1b   :  { %229 = vperm.xlu0 %376, %v226_v15  }
  0x81   :  { %v70_v17 = vpop.permute.xlu1 %69 }
  0x82   :  { %v36_v18 = vpop.permute.xlu0 %35 }
  0x83   :  { %v59_v19 = vmul.f32 %v314_v16, %v36_v18 }
  0x85   :  { %v75_v20 = vpop.permute.xlu1 %74  ;;  %v87_v22 = vadd.f32 %v70_v17, %v59_v19 }
  0x86   :  { %v41_v21 = vpop.permute.xlu0 %40 }
  0x87   :  { %v60_v23 = vmul.f32 %v314_v16, %v41_v21  ;;  %v91_v27 = vmax.f32 %v87_v22, 0.0 }
  0x89   :  { %v88_v24 = vadd.f32 %v75_v20, %v60_v23  ;;  %v51_v25 = vpop.permute.xlu1 %50 }
  0x8a   :  { %v46_v26 = vpop.permute.xlu0 %45  ;;  %v62_v29 = vmul.f32 %v314_v16, %v51_v25 }
  0x8b   :  { %v92_v28 = vmax.f32 %v88_v24, 0.0  ;;  %v61_v30 = vmul.f32 %v314_v16, %v46_v26 }
  0x8d   :  { %v358_v31 = vpack.c.bf16 %v92_v28, %v91_v27  ;;  %v85_v32 = vpop.permute.xlu1 %84 }
  0x8e   :  { %v80_v33 = vpop.permute.xlu0 %79  ;;  %v90_v34 = vadd.f32 %v85_v32, %v62_v29 }
  0x8f   :  { %v89_v35 = vadd.f32 %v80_v33, %v61_v30  ;;  %359 = vmatprep.subr.bf16.mxu0 %v358_v31 }
  0x90   :  { %361 = vmatpush3.bf16.msra.mxu0 %v358_v31  ;;  %v94_v36 = vmax.f32 %v90_v34, 0.0 }
  0x91   :  { %v93_v37 = vmax.f32 %v89_v35, 0.0  ;;  %v111_v44 = vpop.permute.xlu1 %110 }
  0x92   :  { %v106_v45 = vpop.permute.xlu0 %105 }
  0x93   :  { %v362_v38 = vpack.c.bf16 %v94_v36, %v93_v37 }
  0x95   :  { %363 = vmatprep.subr.bf16.mxu0 %v362_v38  ;;  %v121_v51 = vpop.permute.xlu1 %120 }
  0x96   :  { %365 = vmatpush3.bf16.msra.mxu0 %v362_v38  ;;  %v116_v54 = vpop.permute.xlu0 %115 }
  0x99   :  { %342 = vmatmul.mubr.msk.f32.vlgmr.msra.gmra.mrb[0].mxu0 %vm123_vm0, %v96_v39 }
  0x9a   :  { %344 = vmatprep.mubr.msk.f32.mxu0 %vm123_vm0, %v97_v40  ;;  %v230_v2 = vpop.permute.xlu0 %229 }
  0x9b   :  { %v235_v3 = vrot.slane %v230_v2, %v234_v1 }
  0x9d   :  { %345 = vmatmul.mubr.msk.f32.gmra.mrb[2].mxu0 %vm123_vm0, %v98_v41 }
 0x16c   :  { %v343_v46 = vpop.f32.mrb[0].mxu0 }
 0x16d   :  { %v208_v47 = vadd.f32 %v343_v46, %v111_v44  ;;  %v202_v48 = vpop.f32.mrb[1].mxu0 }
 0x16e   :  { %v203_v49 = vadd.f32 %v202_v48, %v106_v45 }
 0x16f   :  { %v222_v50 = vmax.f32 %v208_v47, 0.0 }
 0x170   :  { %v221_v52 = vmax.f32 %v203_v49, 0.0  ;;  %v346_v53 = vpop.f32.mrb[2].mxu0 }
 0x171   :  { %v218_v55 = vadd.f32 %v346_v53, %v121_v51  ;;  %v212_v56 = vpop.f32.mrb[3].mxu0 }
 0x172   :  { %v213_v57 = vadd.f32 %v212_v56, %v116_v54  ;;  %v367_v58 = vpack.c.bf16 %v222_v50, %v221_v52 }
 0x173   :  { %v224_v59 = vmax.f32 %v218_v55, 0.0 }
 0x174   :  { %v223_v60 = vmax.f32 %v213_v57, 0.0  ;;  %368 = vmatpush3.bf16.msra.mxu1 %v367_v58 }
 0x175   :  { %369 = vmatprep.subr.bf16.mxu1 %v379_v42 }
 0x176   :  { %v370_v61 = vpack.c.bf16 %v224_v59, %v223_v60 }
 0x178   :  { %371 = vmatpush3.bf16.msra.mxu1 %v370_v61 }
 0x17b   :  { %356 = vmatmul.mubr.msk.f32.vlgmr.msra.gmra.mrb[0].mxu1 %vm123_vm0, %v225_v62 }
 0x24e   :  { %v305_v4 = vpop.f32.mrb[0].mxu1 }
 0x24f   :  { %v306_v5 = vadd.f32 %v305_v4, %v235_v3  ;;  %v357_v6 = vpop.f32.mrb[1].mxu1 }
 0x251   :  { %309 = vst [vmem:[%s494_s7] sm:$0x1] %v306_v5 }

</bundles_post_ra>
